<compile_context>
chip_gen: v7x
topology: tpu7x:2x2x1
jax: 0.10.0
libtpu: 0.0.40
codegen_flags: <defaults>
</compile_context>

<pallas_src>
import functools

import jax
import jax.numpy as jnp
from jax.experimental import pallas as pl
from jax.experimental.pallas import tpu as pltpu


def _mc_dropout_kernel(x_ref, w1_ref, b1_ref, w2_ref, b2_ref, r_ref, out_ref,
                       *, num_estimators, p, ncls):
    E = num_estimators
    TB = x_ref.shape[0]
    HIDP = w1_ref.shape[1]
    NCLSP = w2_ref.shape[1]

    # ---- first linear + ReLU over the whole sample block (one big matmul) ----
    h = jnp.dot(x_ref[...], w1_ref[...], preferred_element_type=jnp.float32)
    h = jnp.maximum(h + b1_ref[...], 0.0)                       # (TB, HIDP)

    # ---- replicate E times + per-estimator inverted dropout ----
    h_rep = jnp.broadcast_to(h.reshape(TB, 1, HIDP), (TB, E, HIDP))
    keep = jnp.where(r_ref[...] >= jnp.float32(p),
                     jnp.float32(1.0 / (1.0 - p)), jnp.float32(0.0))
    h_drop = (h_rep * keep).reshape(TB * E, HIDP)

    # ---- second linear, fused across samples and estimators ----
    y = jnp.dot(h_drop, w2_ref[...], preferred_element_type=jnp.float32)
    y = (y + b2_ref[...]).reshape(TB, E, NCLSP)                 # (TB, E, NCLSP)

    # ---- argmax over the real classes (first-max tie break, torch-style) ----
    col = jax.lax.broadcasted_iota(jnp.int32, (TB, E, NCLSP), 2)
    y_valid = jnp.where(col < ncls, y, jnp.float32(-jnp.inf))   # mask padded cols
    y_max = jnp.max(y_valid, axis=-1, keepdims=True)
    pred = jnp.min(jnp.where(y_valid == y_max, col, jnp.int32(NCLSP)),
                   axis=-1)                                     # (TB, E)

    # ---- torch.unique(...)[0][0]: smallest predicted class; count; mean ----
    min_class = jnp.min(pred, axis=-1, keepdims=True)           # (TB, 1)
    match = (pred == min_class).astype(jnp.float32)             # (TB, E)
    cnt = jnp.sum(match, axis=-1, keepdims=True)                # (TB, 1), >= 1
    y_final = jnp.sum(y * match[:, :, None], axis=1) / cnt      # (TB, NCLSP)
    unc = cnt * jnp.float32(1.0 / E)                            # (TB, 1)

    # ---- pack predictions + uncertainty into one lane-dense block ----
    col2 = jax.lax.broadcasted_iota(jnp.int32, (TB, NCLSP), 1)
    out_ref[...] = jnp.where(col2 == ncls, unc, y_final)


def _round_up(v, m):
    return -(-v // m) * m


def mc_dropout_forward(x, w1, b1, w2, b2, key, *, num_estimators, p,
                       block_b=256):
    """Eval-mode MC-Dropout forward (on_batch=True path).

    x: (B, C, H, W) float32, NCHW (flattened row-major like nn.Flatten).
    Returns (y, uncertainty): (B, NCLS) float32, (B,) float32.
    """
    if not (0.0 <= p < 1.0):
        raise ValueError("dropout p must be in [0, 1) for the eval kernel")

    B = x.shape[0]
    D = int(x.shape[1] * x.shape[2] * x.shape[3])
    HID = w1.shape[1]
    NCLS = w2.shape[1]
    E = int(num_estimators)

    HIDP = _round_up(HID, 128)            # lane-dense hidden width
    NCLSP = _round_up(NCLS + 1, 128)      # +1 column for packed uncertainty

    TB = min(B, block_b)                  # samples per grid step
    n_blocks = -(-B // TB)
    B_pad = n_blocks * TB

    x_flat = x.reshape(B, D).astype(jnp.float32)
    if B_pad != B:
        x_flat = jnp.pad(x_flat, ((0, B_pad - B), (0, 0)))

    # One-time host-side zero padding of weights to lane-dense shapes.
    w1p = jnp.zeros((D, HIDP), jnp.float32).at[:, :HID].set(w1)
    b1p = jnp.zeros((1, HIDP), jnp.float32).at[0, :HID].set(b1)
    w2p = jnp.zeros((HIDP, NCLSP), jnp.float32).at[:HID, :NCLS].set(w2)
    b2p = jnp.zeros((1, NCLSP), jnp.float32).at[0, :NCLS].set(b2)

    # Host-side uniforms for the per-estimator dropout masks.
    r = jax.random.uniform(key, (B_pad, E, HIDP), dtype=jnp.float32)

    kernel = functools.partial(_mc_dropout_kernel,
                               num_estimators=E, p=float(p), ncls=NCLS)

    out = pl.pallas_call(
        kernel,
        out_shape=jax.ShapeDtypeStruct((B_pad, NCLSP), jnp.float32),
        grid=(n_blocks,),
        in_specs=[
            pl.BlockSpec((TB, D), lambda i: (i, 0)),           # x block
            pl.BlockSpec((D, HIDP), lambda i: (0, 0)),         # W1 (resident)
            pl.BlockSpec((1, HIDP), lambda i: (0, 0)),         # b1
            pl.BlockSpec((HIDP, NCLSP), lambda i: (0, 0)),     # W2 (resident)
            pl.BlockSpec((1, NCLSP), lambda i: (0, 0)),        # b2
            pl.BlockSpec((TB, E, HIDP), lambda i: (i, 0, 0)),  # dropout uniforms
        ],
        out_specs=pl.BlockSpec((TB, NCLSP), lambda i: (i, 0)),
        compiler_params=pltpu.CompilerParams(
            dimension_semantics=("parallel",)),  # no carried state across steps
    )(x_flat, w1p, b1p, w2p, b2p, r)

    y = out[:B, :NCLS]
    uncertainty = out[:B, NCLS]
    return y, uncertainty


if __name__ == "__main__":
    # Small deterministic setup consistent with the module's forward
    # (x of shape (B, C, H, W), num_estimators replicas, on_batch=True eval).
    B, C, H, W = 2, 4, 16, 16
    D = C * H * W
    HID = 32
    NCLS = 16
    NUM_ESTIMATORS = 8
    DROPOUT_P = 0.3

    key = jax.random.PRNGKey(0)
    kx, k1, k2, k3, k4, kdrop = jax.random.split(key, 6)

    x = jax.random.normal(kx, (B, C, H, W), dtype=jnp.float32)
    w1 = jax.random.normal(k1, (D, HID), dtype=jnp.float32) * (1.0 / jnp.sqrt(D))
    b1 = jax.random.normal(k2, (HID,), dtype=jnp.float32) * 0.1
    w2 = jax.random.normal(k3, (HID, NCLS), dtype=jnp.float32) * (1.0 / jnp.sqrt(HID))
    b2 = jax.random.normal(k4, (NCLS,), dtype=jnp.float32) * 0.1

    # TODO(synk): training-mode passthrough and the on_batch=False (python loop)
    # path are plain model calls and are not part of the Pallas hot path here.
    y, uncertainty = mc_dropout_forward(
        x, w1, b1, w2, b2, kdrop,
        num_estimators=NUM_ESTIMATORS, p=DROPOUT_P)

    jax.block_until_ready((y, uncertainty))
    assert y.shape == (B, NCLS) and uncertainty.shape == (B,)
    assert bool(jnp.all(jnp.isfinite(y)))
    assert bool(jnp.all((uncertainty > 0.0) & (uncertainty <= 1.0)))
    print("KERNEL_OK")
</pallas_src>

<mosaic_0001>
module attributes {stable_mosaic.version = 11 : i64} {
  func.func @_mc_dropout_kernel(%arg0: i32, %arg1: memref<2x1024xf32, #tpu.memory_space<vmem>>, %arg2: memref<1024x128xf32, #tpu.memory_space<vmem>>, %arg3: memref<1x128xf32, #tpu.memory_space<vmem>>, %arg4: memref<128x128xf32, #tpu.memory_space<vmem>>, %arg5: memref<1x128xf32, #tpu.memory_space<vmem>>, %arg6: memref<2x8x128xf32, #tpu.memory_space<vmem>>, %arg7: memref<2x128xf32, #tpu.memory_space<vmem>>) attributes {dimension_semantics = [#tpu.dimension_semantics<parallel>], iteration_bounds = array<i64: 1>, scalar_prefetch = 0 : i64, scratch_operands = 0 : i64, tpu.core_type = #tpu.core_type<tc>, window_params = [{transform_indices = @transform_0, window_bounds = array<i64: 2, 1024>}, {pipeline_mode = #tpu.pipeline_mode<synchronous>, transform_indices = @transform_1, window_bounds = array<i64: 1024, 128>}, {pipeline_mode = #tpu.pipeline_mode<synchronous>, transform_indices = @transform_2, window_bounds = array<i64: 1, 128>}, {pipeline_mode = #tpu.pipeline_mode<synchronous>, transform_indices = @transform_3, window_bounds = array<i64: 128, 128>}, {pipeline_mode = #tpu.pipeline_mode<synchronous>, transform_indices = @transform_4, window_bounds = array<i64: 1, 128>}, {transform_indices = @transform_5, window_bounds = array<i64: 2, 8, 128>}, {transform_indices = @transform_6, window_bounds = array<i64: 2, 128>}]} {
    %c0 = arith.constant 0 : index
    %c0_0 = arith.constant 0 : index
    %0 = vector.load %arg1[%c0, %c0_0] : memref<2x1024xf32, #tpu.memory_space<vmem>>, vector<2x1024xf32>
    %c0_1 = arith.constant 0 : index
    %c0_2 = arith.constant 0 : index
    %1 = vector.load %arg2[%c0_1, %c0_2] : memref<1024x128xf32, #tpu.memory_space<vmem>>, vector<1024x128xf32>
    %cst = arith.constant dense<0.000000e+00> : vector<2x128xf32>
    %2 = tpu.matmul %0, %1, %cst {dimension_numbers = #tpu.dot_dimension_numbers<[1], [0], [0], [1], [0, 0, 1, 1], [], []>} : vector<2x1024xf32>, vector<1024x128xf32>, vector<2x128xf32> -> vector<2x128xf32>
    %c0_3 = arith.constant 0 : index
    %c0_4 = arith.constant 0 : index
    %3 = vector.load %arg3[%c0_3, %c0_4] : memref<1x128xf32, #tpu.memory_space<vmem>>, vector<1x128xf32>
    %4 = vector.broadcast %3 : vector<1x128xf32> to vector<2x128xf32>
    %5 = arith.addf %2, %4 : vector<2x128xf32>
    %cst_5 = arith.constant 0.000000e+00 : f32
    %6 = vector.broadcast %cst_5 : f32 to vector<2x128xf32>
    %7 = arith.maximumf %5, %6 : vector<2x128xf32>
    %8 = vector.shape_cast %7 : vector<2x128xf32> to vector<2x1x128xf32>
    %9 = vector.shape_cast %8 : vector<2x1x128xf32> to vector<2x1x128xf32>
    %10 = vector.broadcast %9 : vector<2x1x128xf32> to vector<2x8x128xf32>
    %c0_6 = arith.constant 0 : index
    %c0_7 = arith.constant 0 : index
    %c0_8 = arith.constant 0 : index
    %11 = vector.load %arg6[%c0_6, %c0_7, %c0_8] : memref<2x8x128xf32, #tpu.memory_space<vmem>>, vector<2x8x128xf32>
    %cst_9 = arith.constant 3.000000e-01 : f32
    %12 = vector.broadcast %cst_9 : f32 to vector<2x8x128xf32>
    %13 = arith.cmpf oge, %11, %12 : vector<2x8x128xf32>
    %cst_10 = arith.constant 1.42857146 : f32
    %cst_11 = arith.constant 0.000000e+00 : f32
    %14 = vector.broadcast %cst_10 : f32 to vector<2x8x128xf32>
    %15 = vector.broadcast %cst_11 : f32 to vector<2x8x128xf32>
    %16 = arith.select %13, %14, %15 : vector<2x8x128xi1>, vector<2x8x128xf32>
    %17 = arith.mulf %10, %16 : vector<2x8x128xf32>
    %18 = vector.shape_cast %17 : vector<2x8x128xf32> to vector<16x128xf32>
    %c0_12 = arith.constant 0 : index
    %c0_13 = arith.constant 0 : index
    %19 = vector.load %arg4[%c0_12, %c0_13] : memref<128x128xf32, #tpu.memory_space<vmem>>, vector<128x128xf32>
    %cst_14 = arith.constant dense<0.000000e+00> : vector<16x128xf32>
    %20 = tpu.matmul %18, %19, %cst_14 {dimension_numbers = #tpu.dot_dimension_numbers<[1], [0], [0], [1], [0, 0, 1, 1], [], []>} : vector<16x128xf32>, vector<128x128xf32>, vector<16x128xf32> -> vector<16x128xf32>
    %c0_15 = arith.constant 0 : index
    %c0_16 = arith.constant 0 : index
    %21 = vector.load %arg5[%c0_15, %c0_16] : memref<1x128xf32, #tpu.memory_space<vmem>>, vector<1x128xf32>
    %22 = vector.broadcast %21 : vector<1x128xf32> to vector<16x128xf32>
    %23 = arith.addf %20, %22 : vector<16x128xf32>
    %24 = vector.shape_cast %23 : vector<16x128xf32> to vector<2x8x128xf32>
    %25 = tpu.iota {dimensions = array<i32: 2>} : vector<2x8x128xi32>
    %c16_i32 = arith.constant 16 : i32
    %26 = vector.broadcast %c16_i32 : i32 to vector<2x8x128xi32>
    %27 = arith.cmpi slt, %25, %26 : vector<2x8x128xi32>
    %cst_17 = arith.constant 0xFF800000 : f32
    %28 = vector.broadcast %cst_17 : f32 to vector<2x8x128xf32>
    %29 = arith.select %27, %24, %28 : vector<2x8x128xi1>, vector<2x8x128xf32>
    %cst_18 = arith.constant dense<0xFF800000> : vector<2x8xf32>
    %30 = vector.multi_reduction <maximumf>, %29, %cst_18 [2] : vector<2x8x128xf32> to vector<2x8xf32>
    %31 = vector.shape_cast %30 : vector<2x8xf32> to vector<2x8x1xf32>
    %32 = vector.broadcast %31 : vector<2x8x1xf32> to vector<2x8x128xf32>
    %33 = arith.cmpf oeq, %29, %32 : vector<2x8x128xf32>
    %c128_i32 = arith.constant 128 : i32
    %34 = vector.broadcast %c128_i32 : i32 to vector<2x8x128xi32>
    %35 = arith.select %33, %25, %34 : vector<2x8x128xi1>, vector<2x8x128xi32>
    %cst_19 = arith.constant dense<2147483647> : vector<2x8xi32>
    %36 = vector.multi_reduction <minsi>, %35, %cst_19 [2] : vector<2x8x128xi32> to vector<2x8xi32>
    %cst_20 = arith.constant dense<2147483647> : vector<2xi32>
    %37 = vector.multi_reduction <minsi>, %36, %cst_20 [1] : vector<2x8xi32> to vector<2xi32>
    %38 = vector.shape_cast %37 : vector<2xi32> to vector<2x1xi32>
    %39 = vector.broadcast %38 : vector<2x1xi32> to vector<2x8xi32>
    %40 = arith.cmpi eq, %36, %39 : vector<2x8xi32>
    %41 = arith.extui %40 : vector<2x8xi1> to vector<2x8xi32>
    %42 = arith.sitofp %41 : vector<2x8xi32> to vector<2x8xf32>
    %cst_21 = arith.constant dense<0.000000e+00> : vector<2xf32>
    %43 = vector.multi_reduction <add>, %42, %cst_21 [1] : vector<2x8xf32> to vector<2xf32>
    %44 = vector.shape_cast %43 : vector<2xf32> to vector<2x1xf32>
    %45 = vector.shape_cast %42 : vector<2x8xf32> to vector<2x8x1xf32>
    %46 = vector.broadcast %45 : vector<2x8x1xf32> to vector<2x8x128xf32>
    %47 = arith.mulf %24, %46 : vector<2x8x128xf32>
    %cst_22 = arith.constant dense<0.000000e+00> : vector<2x128xf32>
    %48 = vector.multi_reduction <add>, %47, %cst_22 [1] : vector<2x8x128xf32> to vector<2x128xf32>
    %49 = vector.broadcast %44 : vector<2x1xf32> to vector<2x128xf32>
    %50 = arith.divf %48, %49 : vector<2x128xf32>
    %cst_23 = arith.constant 1.250000e-01 : f32
    %51 = vector.broadcast %cst_23 : f32 to vector<2x1xf32>
    %52 = arith.mulf %44, %51 : vector<2x1xf32>
    %53 = tpu.iota {dimensions = array<i32: 1>} : vector<2x128xi32>
    %c16_i32_24 = arith.constant 16 : i32
    %54 = vector.broadcast %c16_i32_24 : i32 to vector<2x128xi32>
    %55 = arith.cmpi eq, %53, %54 : vector<2x128xi32>
    %56 = vector.shape_cast %52 : vector<2x1xf32> to vector<2x1xf32>
    %57 = vector.broadcast %56 : vector<2x1xf32> to vector<2x128xf32>
    %58 = arith.select %55, %57, %50 : vector<2x128xi1>, vector<2x128xf32>
    %c0_25 = arith.constant 0 : index
    %c0_26 = arith.constant 0 : index
    %59 = vector.load %arg7[%c0_25, %c0_26] : memref<2x128xf32, #tpu.memory_space<vmem>>, vector<2x128xf32>
    tpu.vector_store %arg7[%c0_25, %c0_26], %58 {strides = array<i32>} : memref<2x128xf32, #tpu.memory_space<vmem>>, vector<2x128xf32>,
    return
  }
  func.func @transform_0(%arg0: i32) -> (i32, i32) {
    %c0_i32 = arith.constant 0 : i32
    %c0_i32_0 = arith.constant 0 : i32
    return %arg0, %c0_i32 : i32, i32
  }
  func.func @transform_1(%arg0: i32) -> (i32, i32) {
    %c0_i32 = arith.constant 0 : i32
    %c0_i32_0 = arith.constant 0 : i32
    %c0_i32_1 = arith.constant 0 : i32
    return %c0_i32, %c0_i32_0 : i32, i32
  }
  func.func @transform_2(%arg0: i32) -> (i32, i32) {
    %c0_i32 = arith.constant 0 : i32
    %c0_i32_0 = arith.constant 0 : i32
    %c0_i32_1 = arith.constant 0 : i32
    return %c0_i32, %c0_i32_0 : i32, i32
  }
  func.func @transform_3(%arg0: i32) -> (i32, i32) {
    %c0_i32 = arith.constant 0 : i32
    %c0_i32_0 = arith.constant 0 : i32
    %c0_i32_1 = arith.constant 0 : i32
    return %c0_i32, %c0_i32_0 : i32, i32
  }
  func.func @transform_4(%arg0: i32) -> (i32, i32) {
    %c0_i32 = arith.constant 0 : i32
    %c0_i32_0 = arith.constant 0 : i32
    %c0_i32_1 = arith.constant 0 : i32
    return %c0_i32, %c0_i32_0 : i32, i32
  }
  func.func @transform_5(%arg0: i32) -> (i32, i32, i32) {
    %c0_i32 = arith.constant 0 : i32
    %c0_i32_0 = arith.constant 0 : i32
    %c0_i32_1 = arith.constant 0 : i32
    return %arg0, %c0_i32, %c0_i32_0 : i32, i32, i32
  }
  func.func @transform_6(%arg0: i32) -> (i32, i32) {
    %c0_i32 = arith.constant 0 : i32
    %c0_i32_0 = arith.constant 0 : i32
    return %arg0, %c0_i32 : i32, i32
  }
}

</mosaic_0001>

<bundles_post_ra>
// kernel: tpu_custom_call.1
= control target key start
LH: loop header
LB: loop body
LE: loop exit
PB: predicated region body
PF: predicated region fallthrough
CT: control target
= control target key end

     0   :  { %11 = vsyncpa [#allocation3], 0  ;;  %s1448_s0 = inlined_call_operand.hbm [shape: f32[2,1024], index: 0, kind: input, shape index: {}]   ;;  %s1449_s1 = inlined_call_operand.hbm [shape: f32[1024,128], index: 1, kind: input, shape index: {}]   ;;  %s1450_s2 = inlined_call_operand.vmem [shape: f32[1,128], index: 2, kind: input, shape index: {}]   ;;  %s1451_s3 = inlined_call_operand.hbm [shape: f32[128,128], index: 3, kind: input, shape index: {}]   ;;  %s1452_s4 = inlined_call_operand.vmem [shape: f32[1,128], index: 4, kind: input, shape index: {}]   ;;  %s1453_s5 = inlined_call_operand.vmem [shape: f32[2,8,128], index: 5, kind: input, shape index: {}]   ;;  %s1454_s6 = inlined_call_operand.hbm [shape: f32[2,128], index: 6, kind: output, shape index: {}]  }
   0x1   :  { %12 = vsyncpa [#allocation6], 0 }
   0x2   :  { %13 = vsyncpa [#allocation4], 0  ;;  %s1288_s21 = smov [#allocation5]   ;;  %s1194_s25 = scalar_lea.hbm %s1449_s1, 16384 }
   0x3   :  { %s29_s22 = sshll.u32 %s1288_s21, 4  ;;  %p1195_p0 = scmp.ne.s32.totalorder %s1449_s1, %s1194_s25  ;;  %s30_s22 = int_to_ptr.vmem [resolvable:$true] %s29_s22 }
   0x4   :  { %p1198_p1 = scmp.lt.u32.totalorder %s1194_s25, %s1449_s1 }
   0x6   :  { %p1200_p2 = pnand %p1198_p1, %p1195_p0 }
   0x8   :  { %1203 = shalt.err (!%p1200_p2)
}
   0x9   :  { %s1204_s30 = scalar_lea.vmem %s30_s22, 16384  ;;  %p1209_p4 = scmp.lt.s32.totalorder %s30_s22, %s30_s22 }
   0xa   :  { %p1205_p3 = scmp.ne.s32.totalorder %s30_s22, %s1204_s30  ;;  %p1210_p5 = scmp.lt.s32.totalorder %s1204_s30, %s1204_s30 }
   0xc   :  { %p1211_p6 = por %p1210_p5, %p1209_p4 }
   0xe   :  { %p1212_p7 = pnand %p1211_p6, %p1205_p3 }
  0x10   :  { %1215 = shalt.err (!%p1212_p7)
}
  0x11   :  { %s1289_s7 = smov 128   ;;  %s1290_s8 = smov 8  }
  0x12   :  { %35 = dma.hbm_to_vmem [thread:$0]  %s1449_s1, 16384, %s30_s22, [#allocation6], %s1289_s7, %s1289_s7, %s1290_s8  }
  0x13   :  { %s1291_s11 = smov [#allocation2]   ;;  %s1292_s13 = smov [#allocation7]  }
  0x14   :  { %s20_s12 = sshll.u32 %s1291_s11, 4  ;;  %s43_s14 = sshll.u32 %s1292_s13, 4  ;;  %s21_s12 = int_to_ptr.vmem [resolvable:$true] %s20_s12  ;;  %s44_s14 = int_to_ptr.vmem [resolvable:$true] %s43_s14 }
  0x15   :  { %s1216_s17 = scalar_lea.hbm %s1448_s0, 256 }
  0x16   :  { %p1217_p8 = scmp.ne.s32.totalorder %s1448_s0, %s1216_s17  ;;  %p1220_p9 = scmp.lt.u32.totalorder %s1216_s17, %s1448_s0 }
  0x18   :  { %p1222_p10 = pnand %p1220_p9, %p1217_p8 }
  0x1a   :  { %1225 = shalt.err (!%p1222_p10)
}
  0x1b   :  { %s1226_s1 = scalar_lea.vmem %s21_s12, 256  ;;  %p1231_p12 = scmp.lt.s32.totalorder %s21_s12, %s21_s12 }
  0x1c   :  { %p1227_p11 = scmp.ne.s32.totalorder %s21_s12, %s1226_s1  ;;  %p1232_p13 = scmp.lt.s32.totalorder %s1226_s1, %s1226_s1 }
  0x1e   :  { %p1233_p0 = por %p1232_p13, %p1231_p12 }
  0x20   :  { %p1234_p1 = pnand %p1233_p0, %p1227_p11 }
  0x22   :  { %1237 = shalt.err (!%p1234_p1)
}
  0x23   :  { %23 = dma.hbm_to_vmem [thread:$0]  %s1448_s0, 256, %s21_s12, [#allocation3]  }
  0x24   :  { %s1238_s26 = scalar_lea.hbm %s1451_s3, 2048 }
  0x25   :  { %p1239_p2 = scmp.ne.s32.totalorder %s1451_s3, %s1238_s26  ;;  %p1242_p3 = scmp.lt.u32.totalorder %s1238_s26, %s1451_s3 }
  0x27   :  { %p1244_p4 = pnand %p1242_p3, %p1239_p2 }
  0x29   :  { %1247 = shalt.err (!%p1244_p4)
}
  0x2a   :  { %s1248_s9 = scalar_lea.vmem %s44_s14, 2048  ;;  %p1253_p6 = scmp.lt.s32.totalorder %s44_s14, %s44_s14 }
  0x2b   :  { %p1249_p5 = scmp.ne.s32.totalorder %s44_s14, %s1248_s9  ;;  %p1254_p7 = scmp.lt.s32.totalorder %s1248_s9, %s1248_s9 }
  0x2d   :  { %p1255_p8 = por %p1254_p7, %p1253_p6 }
  0x2f   :  { %p1256_p9 = pnand %p1255_p8, %p1249_p5 }
  0x31   :  { %1259 = shalt.err (!%p1256_p9)
}
  0x32   :  { %49 = dma.hbm_to_vmem [thread:$0]  %s1451_s3, 2048, %s44_s14, [#allocation6], %s1289_s7, %s1289_s7, %s1290_s8  }
  0x33   :  { %1282 = dma.done.wait [#allocation3], 256  }
  0x34   :  { %1283 = vsyncadd [#allocation3], 4294967040 }
  0x35   :  { %1284 = dma.done.wait [#allocation6], 18432  }
  0x36   :  { %1285 = vsyncadd [#allocation6], 4294948864  ;;  %v81_v0 = vld [vmem:[#allocation5 + $0x80] sm:$0xff]  ;;  %v82_v1 = vld [vmem:[#allocation5 + $0x88] sm:$0xff]  ;;  %v1293_v47 = vmov 1983009808   ;;  %v206_v49 = vlaneseq }
  0x37   :  { %v65_v2 = vld [vmem:[#allocation5] sm:$0xff]  ;;  %v1012_v3 = vpack.c.bf16 %v82_v1, %v81_v0  ;;  %v66_v4 = vld [vmem:[#allocation5 + $0x8] sm:$0xff]  ;;  %v83_v11 = vld [vmem:[#allocation5 + $0x90] sm:$0xff]  ;;  %v204_v48 = vunpack.c.l.s4 %v1293_v47  ;;  %vm713_vm7 = vcmask 1041409   ;;  %vm715_vm8 = vcmask 58368  }
  0x38   :  { %v113_v5 = vld [vmem:[#allocation5 + $0x180] sm:$0xff]  ;;  %v114_v6 = vld [vmem:[#allocation5 + $0x188] sm:$0xff]  ;;  %v1014_v7 = vpack.c.bf16 %v66_v4, %v65_v2  ;;  %v84_v13 = vld [vmem:[#allocation5 + $0x98] sm:$0xff]  ;;  %v1376_v0 = vshrl.u32 %v206_v49, 7 }
  0x39   :  { %v1044_v8 = vpack.c.bf16 %v114_v6, %v113_v5  ;;  %v97_v9 = vld [vmem:[#allocation5 + $0x100] sm:$0xff]  ;;  %v98_v10 = vld [vmem:[#allocation5 + $0x108] sm:$0xff]  ;;  %1013 = vmatprep.subr.bf16.mxu0 %v1012_v3  ;;  %v67_v14 = vld [vmem:[#allocation5 + $0x10] sm:$0xff]  ;;  %v1016_v16 = vpack.c.bf16 %v84_v13, %v83_v11  ;;  %v205_v63 = vunpack.c.0.s8 %v204_v48 }
  0x3a   :  { %v1046_v12 = vpack.c.bf16 %v98_v10, %v97_v9  ;;  %v68_v15 = vld [vmem:[#allocation5 + $0x18] sm:$0xff]  ;;  %1015 = vmatpush3.bf16.msra.mxu0 %v1014_v7  ;;  %v115_v18 = vld [vmem:[#allocation5 + $0x190] sm:$0xff]  ;;  %v85_v23 = vld [vmem:[#allocation5 + $0xa0] sm:$0xff] }
  0x3b   :  { %1045 = vmatprep.subr.bf16.mxu1 %v1044_v8  ;;  %v1018_v17 = vpack.c.bf16 %v68_v15, %v67_v14  ;;  %v116_v19 = vld [vmem:[#allocation5 + $0x198] sm:$0xff]  ;;  %v99_v20 = vld [vmem:[#allocation5 + $0x110] sm:$0xff]  ;;  %v86_v24 = vld [vmem:[#allocation5 + $0xa8] sm:$0xff]  ;;  %1017 = vmatprep.subr.bf16.mxu0 %v1016_v16  ;;  %v1379_v13 = vsub.s32 %v205_v63, %v1376_v0 }
  0x3c   :  { %1047 = vmatpush3.bf16.msra.mxu1 %v1046_v12  ;;  %v1048_v21 = vpack.c.bf16 %v116_v19, %v115_v18  ;;  %v100_v22 = vld [vmem:[#allocation5 + $0x118] sm:$0xff]  ;;  %v1020_v26 = vpack.c.bf16 %v86_v24, %v85_v23  ;;  %v69_v27 = vld [vmem:[#allocation5 + $0x20] sm:$0xff]  ;;  %v70_v28 = vld [vmem:[#allocation5 + $0x28] sm:$0xff] }
  0x3d   :  { %v1050_v25 = vpack.c.bf16 %v100_v22, %v99_v20  ;;  %v117_v29 = vld [vmem:[#allocation5 + $0x1a0] sm:$0xff]  ;;  %v118_v30 = vld [vmem:[#allocation5 + $0x1a8] sm:$0xff]  ;;  %v1022_v33 = vpack.c.bf16 %v70_v28, %v69_v27  ;;  %v87_v35 = vld [vmem:[#allocation5 + $0xb0] sm:$0xff] }
  0x3e   :  { %1049 = vmatprep.subr.bf16.mxu1 %v1048_v21  ;;  %v101_v31 = vld [vmem:[#allocation5 + $0x120] sm:$0xff]  ;;  %v102_v32 = vld [vmem:[#allocation5 + $0x128] sm:$0xff]  ;;  %1019 = vmatpush3.bf16.msra.mxu0 %v1018_v17  ;;  %v1052_v34 = vpack.c.bf16 %v118_v30, %v117_v29  ;;  %v88_v36 = vld [vmem:[#allocation5 + $0xb8] sm:$0xff] }
  0x3f   :  { %v71_v37 = vld [vmem:[#allocation5 + $0x30] sm:$0xff]  ;;  %1021 = vmatprep.subr.bf16.mxu0 %v1020_v26  ;;  %v1054_v38 = vpack.c.bf16 %v102_v32, %v101_v31  ;;  %v1024_v39 = vpack.c.bf16 %v88_v36, %v87_v35  ;;  %v72_v40 = vld [vmem:[#allocation5 + $0x38] sm:$0xff]  ;;  %v89_v46 = vld [vmem:[#allocation5 + $0xc0] sm:$0xff] }
  0x40   :  { %1051 = vmatpush3.bf16.msra.mxu1 %v1050_v25  ;;  %v119_v41 = vld [vmem:[#allocation5 + $0x1b0] sm:$0xff]  ;;  %v120_v42 = vld [vmem:[#allocation5 + $0x1b8] sm:$0xff]  ;;  %v90_v50 = vld [vmem:[#allocation5 + $0xc8] sm:$0xff]  ;;  %v1026_v51 = vpack.c.bf16 %v72_v40, %v71_v37 }
  0x41   :  { %1053 = vmatprep.subr.bf16.mxu1 %v1052_v34  ;;  %v1056_v43 = vpack.c.bf16 %v120_v42, %v119_v41  ;;  %v103_v44 = vld [vmem:[#allocation5 + $0x130] sm:$0xff]  ;;  %v104_v45 = vld [vmem:[#allocation5 + $0x138] sm:$0xff]  ;;  %v121_v52 = vld [vmem:[#allocation5 + $0x1c0] sm:$0xff]  ;;  %v1028_v55 = vpack.c.bf16 %v90_v50, %v89_v46 }
  0x42   :  { %1023 = vmatpush3.bf16.msra.mxu0 %v1022_v33  ;;  %v122_v53 = vld [vmem:[#allocation5 + $0x1c8] sm:$0xff]  ;;  %v1058_v54 = vpack.c.bf16 %v104_v45, %v103_v44  ;;  %v73_v56 = vld [vmem:[#allocation5 + $0x40] sm:$0xff]  ;;  %v91_v61 = vld [vmem:[#allocation5 + $0xd0] sm:$0xff] }
  0x43   :  { %1025 = vmatprep.subr.bf16.mxu0 %v1024_v39  ;;  %v74_v57 = vld [vmem:[#allocation5 + $0x48] sm:$0xff]  ;;  %v105_v58 = vld [vmem:[#allocation5 + $0x140] sm:$0xff]  ;;  %v1060_v59 = vpack.c.bf16 %v122_v53, %v121_v52  ;;  %v92_v62 = vld [vmem:[#allocation5 + $0xd8] sm:$0xff] }
  0x44   :  { %1055 = vmatpush3.bf16.msra.mxu1 %v1054_v38  ;;  %v106_v60 = vld [vmem:[#allocation5 + $0x148] sm:$0xff]  ;;  %v123_v1 = vld [vmem:[#allocation5 + $0x1d0] sm:$0xff]  ;;  %v124_v2 = vld [vmem:[#allocation5 + $0x1d8] sm:$0xff]  ;;  %v1030_v3 = vpack.c.bf16 %v74_v57, %v73_v56  ;;  %v1032_v5 = vpack.c.bf16 %v92_v62, %v91_v61 }
  0x45   :  { %1057 = vmatprep.subr.bf16.mxu1 %v1056_v43  ;;  %v1062_v4 = vpack.c.bf16 %v106_v60, %v105_v58  ;;  %v75_v6 = vld [vmem:[#allocation5 + $0x50] sm:$0xff]  ;;  %v76_v7 = vld [vmem:[#allocation5 + $0x58] sm:$0xff]  ;;  %v1064_v9 = vpack.c.bf16 %v124_v2, %v123_v1  ;;  %v93_v11 = vld [vmem:[#allocation5 + $0xe0] sm:$0xff] }
  0x46   :  { %1027 = vmatpush3.bf16.msra.mxu0 %v1026_v51  ;;  %v107_v8 = vld [vmem:[#allocation5 + $0x150] sm:$0xff]  ;;  %v108_v10 = vld [vmem:[#allocation5 + $0x158] sm:$0xff]  ;;  %v94_v12 = vld [vmem:[#allocation5 + $0xe8] sm:$0xff]  ;;  %v1034_v16 = vpack.c.bf16 %v76_v7, %v75_v6 }
  0x47   :  { %1029 = vmatprep.subr.bf16.mxu0 %v1028_v55  ;;  %v125_v14 = vld [vmem:[#allocation5 + $0x1e0] sm:$0xff]  ;;  %v126_v15 = vld [vmem:[#allocation5 + $0x1e8] sm:$0xff]  ;;  %v1066_v18 = vpack.c.bf16 %v108_v10, %v107_v8  ;;  %v1036_v19 = vpack.c.bf16 %v94_v12, %v93_v11  ;;  %v63_v22 = vld [vmem:[#allocation2] sm:$0xff] }
  0x48   :  { %1059 = vmatpush3.bf16.msra.mxu1 %v1058_v54  ;;  %v77_v17 = vld [vmem:[#allocation5 + $0x60] sm:$0xff]  ;;  %v78_v20 = vld [vmem:[#allocation5 + $0x68] sm:$0xff]  ;;  %v1068_v23 = vpack.c.bf16 %v126_v15, %v125_v14  ;;  %v95_v25 = vld [vmem:[#allocation5 + $0xf0] sm:$0xff]  ;;  %v209_v27 = vrot.slane %v63_v22, %v1379_v13  ;;  %v202_v28 = vcombine.high %v63_v22, %v63_v22 }
  0x49   :  { %1061 = vmatprep.subr.bf16.mxu1 %v1060_v59  ;;  %v109_v21 = vld [vmem:[#allocation5 + $0x160] sm:$0xff]  ;;  %v110_v24 = vld [vmem:[#allocation5 + $0x168] sm:$0xff]  ;;  %v96_v26 = vld [vmem:[#allocation5 + $0xf8] sm:$0xff]  ;;  %v1038_v31 = vpack.c.bf16 %v78_v20, %v77_v17 }
  0x4a   :  { %1031 = vmatpush3.bf16.msra.mxu0 %v1030_v3  ;;  %v127_v29 = vld [vmem:[#allocation5 + $0x1f0] sm:$0xff]  ;;  %v128_v30 = vld [vmem:[#allocation5 + $0x1f8] sm:$0xff]  ;;  %v217_v32 = vcombine.high %v209_v27, %v209_v27  ;;  %v216_v33 = vrot.slane %v202_v28, %v1379_v13  ;;  %v1070_v34 = vpack.c.bf16 %v110_v24, %v109_v21  ;;  %v1040_v35 = vpack.c.bf16 %v96_v26, %v95_v25  ;;  %v145_v41 = vld [vmem:[#allocation5 + $0x280] sm:$0xff] }
  0x4b   :  { %1033 = vmatprep.subr.bf16.mxu0 %v1032_v5  ;;  %v79_v36 = vld [vmem:[#allocation5 + $0x70] sm:$0xff]  ;;  %v80_v37 = vld [vmem:[#allocation5 + $0x78] sm:$0xff]  ;;  %v1072_v39 = vpack.c.bf16 %v128_v30, %v127_v29  ;;  %v146_v42 = vld [vmem:[#allocation5 + $0x288] sm:$0xff] }
  0x4c   :  { %1063 = vmatpush3.bf16.msra.mxu1 %v1062_v4  ;;  %v111_v38 = vld [vmem:[#allocation5 + $0x170] sm:$0xff]  ;;  %v112_v40 = vld [vmem:[#allocation5 + $0x178] sm:$0xff]  ;;  %308 = vmatprep.mubr.f32.mxu0 %v217_v32  ;;  %v218_v43 = vcombine.high %v216_v33, %v216_v33  ;;  %v177_v44 = vld [vmem:[#allocation5 + $0x380] sm:$0xff]  ;;  %v1042_v46 = vpack.c.bf16 %v80_v37, %v79_v36  ;;  %v1076_v48 = vpack.c.bf16 %v146_v42, %v145_v41 }
  0x4d   :  { %1065 = vmatprep.subr.bf16.mxu1 %v1064_v9  ;;  %v178_v45 = vld [vmem:[#allocation5 + $0x388] sm:$0xff]  ;;  %v1074_v47 = vpack.c.bf16 %v112_v40, %v111_v38  ;;  %v129_v50 = vld [vmem:[#allocation5 + $0x200] sm:$0xff]  ;;  %v147_v55 = vld [vmem:[#allocation5 + $0x290] sm:$0xff] }
  0x4e   :  { %1035 = vmatpush3.bf16.msra.mxu0 %v1034_v16  ;;  %378 = vmatprep.mubr.f32.mxu1 %v218_v43  ;;  %v130_v51 = vld [vmem:[#allocation5 + $0x208] sm:$0xff]  ;;  %v161_v52 = vld [vmem:[#allocation5 + $0x300] sm:$0xff]  ;;  %v1108_v53 = vpack.c.bf16 %v178_v45, %v177_v44  ;;  %v148_v56 = vld [vmem:[#allocation5 + $0x298] sm:$0xff] }
  0x4f   :  { %1037 = vmatprep.subr.bf16.mxu0 %v1036_v19  ;;  %v162_v54 = vld [vmem:[#allocation5 + $0x308] sm:$0xff]  ;;  %v179_v57 = vld [vmem:[#allocation5 + $0x390] sm:$0xff]  ;;  %v180_v58 = vld [vmem:[#allocation5 + $0x398] sm:$0xff]  ;;  %v1078_v59 = vpack.c.bf16 %v130_v51, %v129_v50  ;;  %v1080_v61 = vpack.c.bf16 %v148_v56, %v147_v55 }
  0x50   :  { %1067 = vmatpush3.bf16.msra.mxu1 %v1066_v18  ;;  %v1110_v60 = vpack.c.bf16 %v162_v54, %v161_v52  ;;  %v131_v62 = vld [vmem:[#allocation5 + $0x210] sm:$0xff]  ;;  %v132_v63 = vld [vmem:[#allocation5 + $0x218] sm:$0xff]  ;;  %v1112_v2 = vpack.c.bf16 %v180_v58, %v179_v57  ;;  %v149_v4 = vld [vmem:[#allocation5 + $0x2a0] sm:$0xff] }
  0x51   :  { %1069 = vmatprep.subr.bf16.mxu1 %v1068_v23  ;;  %v163_v1 = vld [vmem:[#allocation5 + $0x310] sm:$0xff]  ;;  %v164_v3 = vld [vmem:[#allocation5 + $0x318] sm:$0xff]  ;;  %v150_v5 = vld [vmem:[#allocation5 + $0x2a8] sm:$0xff]  ;;  %v1082_v8 = vpack.c.bf16 %v132_v63, %v131_v62 }
  0x52   :  { %1039 = vmatpush3.bf16.msra.mxu0 %v1038_v31  ;;  %v181_v6 = vld [vmem:[#allocation5 + $0x3a0] sm:$0xff]  ;;  %v182_v7 = vld [vmem:[#allocation5 + $0x3a8] sm:$0xff]  ;;  %v1114_v9 = vpack.c.bf16 %v164_v3, %v163_v1  ;;  %v1084_v10 = vpack.c.bf16 %v150_v5, %v149_v4  ;;  %v151_v17 = vld [vmem:[#allocation5 + $0x2b0] sm:$0xff] }
  0x53   :  { %1041 = vmatprep.subr.bf16.mxu0 %v1040_v35  ;;  %v133_v11 = vld [vmem:[#allocation5 + $0x220] sm:$0xff]  ;;  %v134_v12 = vld [vmem:[#allocation5 + $0x228] sm:$0xff]  ;;  %v1116_v15 = vpack.c.bf16 %v182_v7, %v181_v6  ;;  %v152_v18 = vld [vmem:[#allocation5 + $0x2b8] sm:$0xff] }
  0x54   :  { %1071 = vmatpush3.bf16.msra.mxu1 %v1070_v34  ;;  %v165_v14 = vld [vmem:[#allocation5 + $0x320] sm:$0xff]  ;;  %v166_v16 = vld [vmem:[#allocation5 + $0x328] sm:$0xff]  ;;  %v183_v19 = vld [vmem:[#allocation5 + $0x3b0] sm:$0xff]  ;;  %v1086_v21 = vpack.c.bf16 %v134_v12, %v133_v11  ;;  %v1088_v23 = vpack.c.bf16 %v152_v18, %v151_v17 }
  0x55   :  { %1073 = vmatprep.subr.bf16.mxu1 %v1072_v39  ;;  %v184_v20 = vld [vmem:[#allocation5 + $0x3b8] sm:$0xff]  ;;  %v1118_v22 = vpack.c.bf16 %v166_v16, %v165_v14  ;;  %v135_v24 = vld [vmem:[#allocation5 + $0x230] sm:$0xff]  ;;  %v153_v29 = vld [vmem:[#allocation5 + $0x2c0] sm:$0xff] }
  0x56   :  { %1043 = vmatpush3.bf16.msra.mxu0 %v1042_v46  ;;  %v136_v25 = vld [vmem:[#allocation5 + $0x238] sm:$0xff]  ;;  %v167_v26 = vld [vmem:[#allocation5 + $0x330] sm:$0xff]  ;;  %v154_v30 = vld [vmem:[#allocation5 + $0x2c8] sm:$0xff] }
  0x57   :  { %1077 = vmatprep.subr.bf16.mxu0 %v1076_v48  ;;  %v168_v28 = vld [vmem:[#allocation5 + $0x338] sm:$0xff]  ;;  %v185_v31 = vld [vmem:[#allocation5 + $0x3c0] sm:$0xff]  ;;  %v186_v32 = vld [vmem:[#allocation5 + $0x3c8] sm:$0xff]  ;;  %v1090_v34 = vpack.c.bf16 %v136_v25, %v135_v24  ;;  %v1092_v38 = vpack.c.bf16 %v154_v30, %v153_v29 }
  0x58   :  { %1075 = vmatpush3.bf16.msra.mxu1 %v1074_v47  ;;  %v1122_v37 = vpack.c.bf16 %v168_v28, %v167_v26  ;;  %v137_v39 = vld [vmem:[#allocation5 + $0x240] sm:$0xff]  ;;  %v138_v40 = vld [vmem:[#allocation5 + $0x248] sm:$0xff]  ;;  %v1124_v42 = vpack.c.bf16 %v186_v32, %v185_v31  ;;  %v155_v44 = vld [vmem:[#allocation5 + $0x2d0] sm:$0xff] }
  0x59   :  { %1109 = vmatprep.subr.bf16.mxu1 %v1108_v53  ;;  %309 = vmatmul.mubr.f32.vlgmr.msra.gmra.mrb[0].mxu0 %v209_v27  ;;  %v1120_v27 = vpack.c.bf16 %v184_v20, %v183_v19  ;;  %v169_v41 = vld [vmem:[#allocation5 + $0x340] sm:$0xff]  ;;  %v170_v43 = vld [vmem:[#allocation5 + $0x348] sm:$0xff]  ;;  %v156_v45 = vld [vmem:[#allocation5 + $0x2d8] sm:$0xff]  ;;  %v1094_v51 = vpack.c.bf16 %v138_v40, %v137_v39 }
  0x5a   :  { %1079 = vmatpush3.bf16.msra.mxu0 %v1078_v59  ;;  %v187_v48 = vld [vmem:[#allocation5 + $0x3d0] sm:$0xff]  ;;  %v188_v50 = vld [vmem:[#allocation5 + $0x3d8] sm:$0xff]  ;;  %v1126_v53 = vpack.c.bf16 %v170_v43, %v169_v41  ;;  %v1096_v54 = vpack.c.bf16 %v156_v45, %v155_v44  ;;  %v190_v62 = vld [vmem:[#allocation5 + $0x3e8] sm:$0xff] }
  0x5b   :  { %379 = vmatmul.mubr.f32.vlgmr.msra.gmra.mrb[0].mxu1 %v216_v33  ;;  %1081 = vmatprep.subr.bf16.mxu0 %v1080_v61  ;;  %v64_v33 = vld [vmem:[#allocation2 + $0x8] sm:$0xff]  ;;  %v139_v55 = vld [vmem:[#allocation5 + $0x250] sm:$0xff]  ;;  %v1128_v58 = vpack.c.bf16 %v188_v50, %v187_v48  ;;  %v158_v61 = vld [vmem:[#allocation5 + $0x2e8] sm:$0xff] }
  0x5c   :  { %1111 = vmatpush3.bf16.msra.mxu1 %v1110_v60  ;;  %v1384_v35 = vrot.slane %v64_v33, %v1379_v13  ;;  %v219_v36 = vcombine.high %v64_v33, %v64_v33  ;;  %v140_v56 = vld [vmem:[#allocation5 + $0x258] sm:$0xff]  ;;  %v171_v57 = vld [vmem:[#allocation5 + $0x350] sm:$0xff]  ;;  %v157_v60 = vld [vmem:[#allocation5 + $0x2e0] sm:$0xff] }
  0x5d   :  { %1113 = vmatprep.subr.bf16.mxu1 %v1112_v2  ;;  %v172_v59 = vld [vmem:[#allocation5 + $0x358] sm:$0xff]  ;;  %v1098_v63 = vpack.c.bf16 %v140_v56, %v139_v55  ;;  %v1100_v2 = vpack.c.bf16 %v158_v61, %v157_v60  ;;  %v141_v3 = vld [vmem:[#allocation5 + $0x260] sm:$0xff]  ;;  %v142_v4 = vld [vmem:[#allocation5 + $0x268] sm:$0xff] }
  0x5e   :  { %1083 = vmatpush3.bf16.msra.mxu0 %v1082_v8  ;;  %v234_v46 = vcombine.high %v1384_v35, %v1384_v35  ;;  %v233_v47 = vrot.slane %v219_v36, %v1379_v13  ;;  %v189_v13 = vld [vmem:[#allocation5 + $0x3e0] sm:$0xff]  ;;  %v1130_v1 = vpack.c.bf16 %v172_v59, %v171_v57  ;;  %v174_v7 = vld [vmem:[#allocation5 + $0x368] sm:$0xff]  ;;  %v159_v8 = vld [vmem:[#allocation5 + $0x2f0] sm:$0xff]  ;;  %v1102_v12 = vpack.c.bf16 %v142_v4, %v141_v3 }
  0x5f   :  { %1085 = vmatprep.subr.bf16.mxu0 %v1084_v10  ;;  %v173_v5 = vld [vmem:[#allocation5 + $0x360] sm:$0xff]  ;;  %v1132_v6 = vpack.c.bf16 %v190_v62, %v189_v13  ;;  %v191_v10 = vld [vmem:[#allocation5 + $0x3f0] sm:$0xff]  ;;  %v192_v11 = vld [vmem:[#allocation5 + $0x3f8] sm:$0xff]  ;;  %v1294_v57 = vmov 1966171168  }
  0x60   :  { %1115 = vmatpush3.bf16.msra.mxu1 %v1114_v9  ;;  %448 = vmatprep.mubr.f32.mxu0 %v234_v46  ;;  %v235_v52 = vcombine.high %v233_v47, %v233_v47  ;;  %v160_v9 = vld [vmem:[#allocation5 + $0x2f8] sm:$0xff]  ;;  %v1134_v14 = vpack.c.bf16 %v174_v7, %v173_v5  ;;  %v143_v16 = vld [vmem:[#allocation5 + $0x270] sm:$0xff]  ;;  %v1136_v18 = vpack.c.bf16 %v192_v11, %v191_v10  ;;  %v567_v24 = vld [vmem:[#allocation7 + $0x8] sm:$0xff] }
  0x61   :  { %1117 = vmatprep.subr.bf16.mxu1 %v1116_v15  ;;  %v1104_v15 = vpack.c.bf16 %v160_v9, %v159_v8  ;;  %v144_v17 = vld [vmem:[#allocation5 + $0x278] sm:$0xff]  ;;  %v175_v19 = vld [vmem:[#allocation5 + $0x370] sm:$0xff]  ;;  %v570_v29 = vld [vmem:[#allocation7 + $0x20] sm:$0xff]  ;;  %v1401_v9 = vsub.s32 0, %v1376_v0 }
  0x62   :  { %1087 = vmatpush3.bf16.msra.mxu0 %v1086_v21  ;;  %518 = vmatprep.mubr.f32.mxu1 %v235_v52  ;;  %v176_v20 = vld [vmem:[#allocation5 + $0x378] sm:$0xff]  ;;  %v1106_v21 = vpack.c.bf16 %v144_v17, %v143_v16  ;;  %v568_v25 = vld [vmem:[#allocation7 + $0x10] sm:$0xff]  ;;  %v571_v30 = vld [vmem:[#allocation7 + $0x28] sm:$0xff] }
  0x63   :  { %1089 = vmatprep.subr.bf16.mxu0 %v1088_v23  ;;  %v566_v23 = vld [vmem:[#allocation7] sm:$0xff]  ;;  %v1148_v31 = vpack.c.bf16 %v571_v30, %v570_v29  ;;  %v572_v32 = vld [vmem:[#allocation7 + $0x30] sm:$0xff]  ;;  %v573_v33 = vld [vmem:[#allocation7 + $0x38] sm:$0xff] }
  0x64   :  { %1119 = vmatpush3.bf16.msra.mxu1 %v1118_v22  ;;  %v1138_v22 = vpack.c.bf16 %v176_v20, %v175_v19  ;;  %v1140_v26 = vpack.c.bf16 %v567_v24, %v566_v23  ;;  %v575_v36 = vld [vmem:[#allocation7 + $0x48] sm:$0xff]  ;;  %v577_v39 = vld [vmem:[#allocation7 + $0x58] sm:$0xff]  ;;  %v578_v41 = vld [vmem:[#allocation7 + $0x60] sm:$0xff] }
  0x65   :  { %1121 = vmatprep.subr.bf16.mxu1 %v1120_v27  ;;  %v569_v27 = vld [vmem:[#allocation7 + $0x18] sm:$0xff]  ;;  %v580_v44 = vld [vmem:[#allocation7 + $0x70] sm:$0xff] }
  0x66   :  { %1091 = vmatpush3.bf16.msra.mxu0 %v1090_v34  ;;  %v1144_v28 = vpack.c.bf16 %v569_v27, %v568_v25  ;;  %v1152_v34 = vpack.c.bf16 %v573_v33, %v572_v32  ;;  %v581_v45 = vld [vmem:[#allocation7 + $0x78] sm:$0xff]  ;;  %v815_v48 = vld [vmem:[%s1450_s2] ss:$0 sm:$0xff] }
  0x67   :  { %1093 = vmatprep.subr.bf16.mxu0 %v1092_v38  ;;  %v576_v38 = vld [vmem:[#allocation7 + $0x50] sm:$0xff]  ;;  %v1168_v46 = vpack.c.bf16 %v581_v45, %v580_v44  ;;  %v559_v7 = vld [vmem:[%s1453_s5 + $0x8] sm:$0xff] }
  0x68   :  { %1123 = vmatpush3.bf16.msra.mxu1 %v1122_v37  ;;  %v1160_v40 = vpack.c.bf16 %v577_v39, %v576_v38  ;;  %v558_v5 = vld [vmem:[%s1453_s5] sm:$0xff]  ;;  %vm561_vm1 = vcmp.ge.f32.partialorder %v559_v7, 0.3 }
  0x69   :  { %1125 = vmatprep.subr.bf16.mxu1 %v1124_v42  ;;  %v579_v42 = vld [vmem:[#allocation7 + $0x68] sm:$0xff]  ;;  %vm560_vm0 = vcmp.ge.f32.partialorder %v558_v5, 0.3 }
  0x6a   :  { %1095 = vmatpush3.bf16.msra.mxu0 %v1094_v51  ;;  %v1164_v43 = vpack.c.bf16 %v579_v42, %v578_v41 }
  0x6b   :  { %1097 = vmatprep.subr.bf16.mxu0 %v1096_v54 }
  0x6c   :  { %1127 = vmatpush3.bf16.msra.mxu1 %v1126_v53 }
  0x6d   :  { %1129 = vmatprep.subr.bf16.mxu1 %v1128_v58  ;;  %v527_v58 = vunpack.c.l.s4 %v1294_v57 }
  0x6e   :  { %1099 = vmatpush3.bf16.msra.mxu0 %v1098_v63 }
  0x6f   :  { %1101 = vmatprep.subr.bf16.mxu0 %v1100_v2  ;;  %v528_v63 = vunpack.c.0.s8 %v527_v58 }
  0x70   :  { %1131 = vmatpush3.bf16.msra.mxu1 %v1130_v1 }
  0x71   :  { %1133 = vmatprep.subr.bf16.mxu1 %v1132_v6  ;;  %v531_v4 = vsub.s32 %v528_v63, %v1376_v0 }
  0x72   :  { %1103 = vmatpush3.bf16.msra.mxu0 %v1102_v12  ;;  %v1295_v12 = vmov 0.0  }
  0x73   :  { %1105 = vmatprep.subr.bf16.mxu0 %v1104_v15  ;;  %v563_v17 = vsel %vm561_vm1, 1.4285715, %v1295_v12 }
  0x74   :  { %1135 = vmatpush3.bf16.msra.mxu1 %v1134_v14  ;;  %v562_v14 = vsel %vm560_vm0, 1.4285715, %v1295_v12 }
  0x75   :  { %1137 = vmatprep.subr.bf16.mxu1 %v1136_v18 }
  0x76   :  { %1107 = vmatpush3.bf16.msra.mxu0 %v1106_v21  ;;  %v1408_v21 = vand.u32 127, %v206_v49 }
  0x77   :  { %1141 = vmatprep.subr.bf16.mxu0 %v1140_v26 }
  0x78   :  { %1139 = vmatpush3.bf16.msra.mxu1 %v1138_v22  ;;  %v816_v22 = vld [vmem:[%s1452_s4] ss:$0 sm:$0xff]  ;;  %vm666_vm2 = vcmp.lt.s32.totalorder %v1408_v21, 16  ;;  %s1297_s4 = smov [#allocation8]   ;;  %vm791_vm12 = vcmp.eq.s32.totalorder %v1408_v21, 16 }
  0x79   :  { %449 = vmatmul.mubr.f32.vlgmr.msra.gmra.mrb[2].mxu0 %v1384_v35  ;;  %v574_v35 = vld [vmem:[#allocation7 + $0x40] sm:$0xff]  ;;  %s805_s14 = sshll.u32 %s1297_s4, 4  ;;  %s806_s14 = int_to_ptr.vmem [resolvable:$true] %s805_s14 }
  0x7a   :  { %1143 = vmatpush3.bf16.msra.mxu0 %v1140_v26  ;;  %v1156_v37 = vpack.c.bf16 %v575_v36, %v574_v35  ;;  %s1260_s15 = scalar_lea.vmem %s806_s14, 32  ;;  %p1265_p11 = scmp.lt.s32.totalorder %s806_s14, %s806_s14 }
  0x7b   :  { %519 = vmatmul.mubr.f32.vlgmr.msra.gmra.mrb[2].mxu1 %v233_v47  ;;  %1145 = vmatprep.subr.bf16.mxu0 %v1144_v28  ;;  %p1261_p10 = scmp.ne.s32.totalorder %s806_s14, %s1260_s15  ;;  %p1266_p12 = scmp.lt.s32.totalorder %s1260_s15, %s1260_s15 }
  0x7d   :  { %p1267_p13 = por %p1266_p12, %p1265_p11 }
  0x7e   :  { %1147 = vmatpush3.bf16.msra.mxu0 %v1144_v28 }
  0x7f   :  { %1149 = vmatprep.subr.bf16.mxu0 %v1148_v31  ;;  %p1268_p0 = pnand %p1267_p13, %p1261_p10 }
  0x82   :  { %1151 = vmatpush3.bf16.msra.mxu0 %v1148_v31 }
  0x83   :  { %1153 = vmatprep.subr.bf16.mxu0 %v1152_v34 }
  0x86   :  { %1155 = vmatpush3.bf16.msra.mxu0 %v1152_v34 }
  0x87   :  { %1157 = vmatprep.subr.bf16.mxu0 %v1156_v37 }
  0x8a   :  { %1159 = vmatpush3.bf16.msra.mxu0 %v1156_v37 }
  0x8b   :  { %1161 = vmatprep.subr.bf16.mxu0 %v1160_v40 }
  0x8e   :  { %1163 = vmatpush3.bf16.msra.mxu0 %v1160_v40 }
  0x8f   :  { %1165 = vmatprep.subr.bf16.mxu0 %v1164_v43 }
  0x92   :  { %1167 = vmatpush3.bf16.msra.mxu0 %v1164_v43 }
  0x93   :  { %1169 = vmatprep.subr.bf16.mxu0 %v1168_v46 }
  0x96   :  { %1171 = vmatpush3.bf16.msra.mxu0 %v1168_v46 }
 0x12c   :  { %v851_v47 = vpop.f32.mrb[0].mxu0 }
 0x12d   :  { %v852_v50 = vpop.f32.mrb[1].mxu0 }
 0x12e   :  { %v886_v51 = vpop.f32.mrb[0].mxu1  ;;  %v853_v52 = vadd.f32 %v852_v50, %v851_v47 }
 0x12f   :  { %v887_v53 = vpop.f32.mrb[1].mxu1 }
 0x130   :  { %v888_v54 = vadd.f32 %v887_v53, %v886_v51  ;;  %v311_v55 = vadd.f32 %v853_v52, %v815_v48  ;;  %v707_v52 = vsub.s32 %v1408_v21, %v1376_v0 }
 0x132   :  { %v381_v56 = vadd.f32 %v888_v54, %v311_v55 }
 0x14c   :  { %v921_v59 = vpop.f32.mrb[2].mxu0 }
 0x14d   :  { %v922_v60 = vpop.f32.mrb[3].mxu0 }
 0x14e   :  { %v956_v61 = vpop.f32.mrb[2].mxu1  ;;  %v923_v13 = vadd.f32 %v922_v60, %v921_v59 }
 0x14f   :  { %v957_v62 = vpop.f32.mrb[3].mxu1 }
 0x150   :  { %v958_v1 = vadd.f32 %v957_v62, %v956_v61  ;;  %v451_v2 = vadd.f32 %v923_v13, %v381_v56 }
 0x152   :  { %v521_v3 = vadd.f32 %v958_v1, %v451_v2  ;;  %v1296_v2 = vmov 0  }
 0x153   :  { %1182 = vset.pattern.permute.xlu0 %v1296_v2 }
 0x154   :  { %v524_v6 = vmax.f32 %v521_v3, 0.0 }
 0x156   :  { %v532_v8 = vrot.slane %v524_v6, %v531_v4  ;;  %v737_v6 = vsub.s32 1, %v1376_v0 }
 0x158   :  { %v533_v10 = vcombine.high %v532_v8, %v532_v8  ;;  %v540_v11 = vrot.slane %v532_v8, %v531_v4 }
 0x15a   :  { %v547_v15 = vrot.slane %v533_v10, %v531_v4  ;;  %v551_v16 = vrot.slane %v540_v11, %v1401_v9 }
 0x15c   :  { %v564_v18 = vmul.f32 %v562_v14, %v551_v16  ;;  %v555_v19 = vrot.slane %v547_v15, %v1401_v9 }
 0x15e   :  { %1009 = vmatprep.mubr.f32.mxu0 %v564_v18  ;;  %v565_v20 = vmul.f32 %v563_v17, %v555_v19 }
 0x160   :  { %1010 = vmatmul.mubr.f32.vlgmr.msra.gmra.mrb[4].mxu0 %v565_v20 }
 0x233   :  { %v1011_v23 = vpop.f32.mrb[4].mxu0 }
 0x234   :  { %v655_v24 = vpop.f32.mrb[5].mxu0  ;;  %v1416_v26 = vadd.f32 %v1011_v23, %v816_v22 }
 0x235   :  { %v1414_v25 = vadd.f32 %v816_v22, %v655_v24 }
 0x236   :  { %v668_v28 = vsel %vm666_vm2, %v1416_v26, -inf }
 0x237   :  { %v667_v27 = vsel %vm666_vm2, %v1414_v25, -inf }
 0x238   :  { %669 = vmax.xlane.f32.xlu0 %v667_v27 }
 0x23c   :  { %671 = vmax.xlane.f32.xlu0 %v668_v28 }
 0x2c5   :  { %v670_v49 = vpop.xlane.xlu0 %669 }
 0x2c6   :  { %vm673_vm3 = vcmp.eq.f32.partialorder %v667_v27, %v670_v49 }
 0x2c7   :  { %v675_v29 = vsel %vm673_vm3, %v1408_v21, 128 }
 0x2c8   :  { %v678_v30 = vshra.s32 %v675_v29, 16  ;;  %v677_v36 = vand.u32 65535, %v675_v29 }
 0x2c9   :  { %v672_v31 = vpop.xlane.xlu0 %671 }
 0x2ca   :  { %vm674_vm4 = vcmp.eq.f32.partialorder %v668_v28, %v672_v31  ;;  %v680_v32 = vcvt.s32.f32 %v678_v30  ;;  %v679_v39 = vcvt.s32.f32 %v677_v36 }
 0x2cb   :  { %v676_v33 = vsel %vm674_vm4, %v1408_v21, 128 }
 0x2cc   :  { %681 = vmin.xlane.f32.xlu1 %v680_v32  ;;  %v692_v34 = vshra.s32 %v676_v33, 16  ;;  %v691_v37 = vand.u32 65535, %v676_v33 }
 0x2ce   :  { %v694_v35 = vcvt.s32.f32 %v692_v34  ;;  %v693_v42 = vcvt.s32.f32 %v691_v37 }
 0x2d0   :  { %695 = vmin.xlane.f32.xlu1 %v694_v35 }
 0x359   :  { %v682_v38 = vpop.xlane.xlu1 %681 }
 0x35a   :  { %vm683_vm5 = vcmp.eq.f32.partialorder %v680_v32, %v682_v38  ;;  %v688_v44 = vcvt.f32.s32 %v682_v38 }
 0x35b   :  { %v684_v40 = vsel %vm683_vm5, %v679_v39, inf }
 0x35c   :  { %685 = vmin.xlane.f32.xlu0 %v684_v40  ;;  %v689_v48 = vshll.u32 %v688_v44, 16 }
 0x35d   :  { %v696_v41 = vpop.xlane.xlu1 %695 }
 0x35e   :  { %vm697_vm6 = vcmp.eq.f32.partialorder %v694_v35, %v696_v41  ;;  %v702_v46 = vcvt.f32.s32 %v696_v41 }
 0x35f   :  { %v698_v43 = vsel %vm697_vm6, %v693_v42, inf }
 0x360   :  { %699 = vmin.xlane.f32.xlu1 %v698_v43  ;;  %v703_v51 = vshll.u32 %v702_v46, 16 }
 0x3e9   :  { %v686_v45 = vpop.xlane.xlu0 %685 }
 0x3ea   :  { %v687_v47 = vcvt.f32.s32 %v686_v45 }
 0x3ec   :  { %v690_v53 = vadd.s32 %v689_v48, %v687_v47 }
 0x3ed   :  { %v700_v50 = vpop.xlane.xlu1 %699 }
 0x3ee   :  { %v701_v54 = vcvt.f32.s32 %v700_v50  ;;  %v708_v56 = vrot.slane %v690_v53, %v707_v52 }
 0x3f0   :  { %v704_v55 = vadd.s32 %v703_v51, %v701_v54 }
 0x3f2   :  { %v712_v57 = vrot.slane %v704_v55, %v707_v52 }
 0x3f4   :  { %v714_v58 = vsel %vm713_vm7, %v712_v57, %v708_v56 }
 0x3f5   :  { %v716_v59 = vsel %vm715_vm8, %v714_v58, 2147483647 }
 0x3f6   :  { %v718_v60 = vshra.s32 %v716_v59, 16  ;;  %v717_v13 = vand.u32 65535, %v716_v59 }
 0x3f8   :  { %v720_v61 = vcvt.s32.f32 %v718_v60  ;;  %v719_v63 = vcvt.s32.f32 %v717_v13 }
 0x3fa   :  { %721 = vmin.xlane.f32.xlu0 %v720_v61 }
 0x487   :  { %v722_v62 = vpop.xlane.xlu0 %721 }
 0x488   :  { %vm723_vm9 = vcmp.eq.f32.partialorder %v720_v61, %v722_v62  ;;  %v728_v3 = vcvt.f32.s32 %v722_v62 }
 0x489   :  { %v724_v1 = vsel %vm723_vm9, %v719_v63, inf }
 0x48a   :  { %725 = vmin.xlane.f32.xlu1 %v724_v1  ;;  %v729_v5 = vshll.u32 %v728_v3, 16 }
 0x517   :  { %v726_v4 = vpop.xlane.xlu1 %725 }
 0x518   :  { %v727_v7 = vcvt.f32.s32 %v726_v4 }
 0x51a   :  { %v730_v8 = vadd.s32 %v729_v5, %v727_v7 }
 0x51c   :  { %v734_v10 = vrot.slane %v730_v8, %v1401_v9  ;;  %v738_v11 = vrot.slane %v730_v8, %v737_v6 }
 0x51e   :  { %vm739_vm10 = vcmp.eq.s32.totalorder %v690_v53, %v734_v10  ;;  %vm740_vm11 = vcmp.eq.s32.totalorder %v704_v55, %v738_v11 }
 0x51f   :  { %v817_v14 = vsel %vm739_vm10, 1.0, %v1295_v12  ;;  %v818_v15 = vsel %vm740_vm11, 1.0, %v1295_v12 }
 0x520   :  { %v1183_v16 = vpack.i.bf16 %v818_v15, %v817_v14 }
 0x522   :  { %1184 = vperm.xlu0 %1182, %v1183_v16  }
 0x5a1   :  { %v1185_v17 = vpop.permute.xlu0 %1184 }
 0x5a2   :  { %v1187_v18 = vunpack.i.h.bf16 %v1185_v17  ;;  %v1186_v19 = vunpack.i.l.bf16 %v1185_v17 }
 0x5a4   :  { %v760_v20 = vrot.slane %v1187_v18, %v707_v52  ;;  %v756_v22 = vrot.slane %v1186_v19, %v707_v52  ;;  %v769_v9 = vmul.f32 %v1187_v18, %v1416_v26  ;;  %v768_v24 = vmul.f32 %v1186_v19, %v1414_v25 }
 0x5a6   :  { %v761_v0 = vsel %vm713_vm7, %v760_v20, %v756_v22  ;;  %v776_v27 = vrot.slane %v769_v9, 4  ;;  %v770_v28 = vrot.slane %v768_v24, 4 }
 0x5a7   :  { %v763_v23 = vsel %vm715_vm8, %v761_v0, 0.0 }
 0x5a8   :  { %764 = vadd.xlane.f32.xlu1 %v763_v23  ;;  %v777_v49 = vadd.f32 %v776_v27, %v769_v9  ;;  %v771_v12 = vadd.f32 %v770_v28, %v768_v24 }
 0x5aa   :  { %v778_v29 = vrot.slane %v777_v49, 2  ;;  %v772_v32 = vrot.slane %v771_v12, 2 }
 0x5ac   :  { %v779_v33 = vadd.f32 %v778_v29, %v777_v49  ;;  %v773_v34 = vadd.f32 %v772_v32, %v771_v12 }
 0x5ae   :  { %v780_v35 = vrot.slane %v779_v33, 1  ;;  %v774_v36 = vrot.slane %v773_v34, 1 }
 0x5b0   :  { %v781_v38 = vadd.f32 %v780_v35, %v779_v33  ;;  %v775_v26 = vadd.f32 %v774_v36, %v773_v34 }
 0x635   :  { %v765_v30 = vpop.xlane.xlu1 %764 }
 0x636   :  { %v783_v31 = vrot.slane %v765_v30, 1  ;;  %1190 = vrcp.f32 %v765_v30  ;;  %v790_v42 = vmul.f32 0.125, %v765_v30 }
 0x638   :  { %1192 = vrcp.f32 %v783_v31 }
 0x640   :  { %v1191_v37 = vpop.eup %1190 }
 0x641   :  { %v787_v25 = vmul.f32 %v1191_v37, %v775_v26 }
 0x642   :  { %v1193_v39 = vpop.eup %1192 }
 0x643   :  { %v789_v40 = vmul.f32 %v1193_v39, %v781_v38 }
 0x645   :  { %v794_v41 = vrot.slane %v789_v40, 7 }
 0x647   :  { %v795_v43 = vsel %vm713_vm7, %v794_v41, %v787_v25 }
 0x648   :  { %v797_v44 = vsel %vm791_vm12, %v790_v42, %v795_v43 }
 0x649   :  { %798 = vst [vmem:[#allocation8] sm:$0x3] %v797_v44 }
 0x64a   :  { %1271 = shalt.err (!%p1268_p0)
}
 0x64b   :  { %s1272_s18 = scalar_lea.hbm %s1454_s6, 32 }
 0x64c   :  { %p1273_p1 = scmp.ne.s32.totalorder %s1454_s6, %s1272_s18  ;;  %p1276_p2 = scmp.lt.u32.totalorder %s1272_s18, %s1454_s6 }
 0x64e   :  { %p1278_p3 = pnand %p1276_p2, %p1273_p1 }
 0x650   :  { %1281 = shalt.err (!%p1278_p3)
}
 0x651   :  { %808 = dma.vmem_to_hbm [thread:$0]  %s806_s14, 32, %s1454_s6, [#allocation4]  }
 0x652   :  { %1286 = dma.done.wait [#allocation4], 32  }
 0x653   :  { %1287 = vsyncadd [#allocation4], 4294967264 }
 0x654   :  { %812 = vsyncpa [#allocation3], 1 }
 0x655   :  { %813 = vsyncpa [#allocation6], 1 }
 0x656   :  { %814 = vsyncpa [#allocation4], 1 }

</bundles_post_ra>
